<compile_context>
chip_gen: v5e
topology: v5e:2x2
jax: 0.10.0
libtpu: 0.0.40
codegen_flags: <defaults>
</compile_context>

<pallas_src>
import functools

import jax
import jax.numpy as jnp
from jax import lax
from jax.experimental import pallas as pl
from jax.experimental.pallas import tpu as pltpu


def _round_up(n: int, m: int) -> int:
    return ((n + m - 1) // m) * m


def _vmem_budget_bytes() -> int:
    """Generation-aware VMEM budget: physical capacity minus Mosaic headroom."""
    cap = None
    try:
        info_fn = getattr(pltpu, "get_tpu_info", None)
        cap = getattr(info_fn(), "vmem_capacity_bytes", None) if info_fn else None
    except Exception:
        cap = None
    if not cap or cap <= 0:
        cap = 64 * 1024 * 1024            # conservative: v7x has 64 MiB / TensorCore
    headroom = 16 * 1024 * 1024           # Mosaic internal scratch etc.
    return max(8 * 1024 * 1024, int(cap) - headroom)


def _vmem_tile_bytes(rows: int, cols: int, dtype) -> int:
    """VMEM footprint of a (rows, cols) tile: minor dim pads to 128 lanes,
    second-minor pads to the dtype's sublane count (8 f32 / 16 bf16 / 32 i8)."""
    itemsize = jnp.dtype(dtype).itemsize
    sublane = max(8, 32 // max(1, itemsize))
    return _round_up(rows, sublane) * _round_up(cols, 128) * itemsize


def _pick_block_rows(b_rows, max_rows, *, pack=8, target_cap=2048, min_steps=2):
    """Largest batch tile (multiple of `pack`) that divides b_rows, fits
    max_rows/target_cap, and keeps >= min_steps grid steps when possible
    (so v7x's two TensorCores both get work on the 'parallel' batch axis)."""
    limit = max(pack, (min(max_rows, target_cap, b_rows) // pack) * pack)
    n = b_rows // pack
    cands = [pack * d for d in range(1, n + 1) if n % d == 0 and pack * d <= limit]
    if not cands:
        return pack
    multi = [c for c in cands if b_rows // c >= min_steps]
    best = max(multi) if multi else max(cands)
    # Degenerate divisor structure (e.g. prime batch): use a fixed block and
    # pad the batch tail instead of falling back to tiny tiles.
    if best < 128 and b_rows > 4096:
        best = max(pack, (min(limit, 1024) // pack) * pack)
    return best


def fuse_ffn_params(w1, b1, w2, b2, *, compute_dtype=jnp.float32, pack=8):
    """One-time fusion + packing of the FFNetwork parameters (hoist me!).

    w1: [D_in, H]   b1: [1, H] or [H]      (first_layer, stored pre-transposed)
    w2: [H, D_out]  b2: [1, D_out] or [D_out]

    Returns:
      w_block : [pack*D_in, pack*D_out]  block-diagonal kron(I_pack, W1@W2),
                stored in `compute_dtype` (bf16 is MXU-native on v5e/v6e/v7x).
      b_packed: [1, pack*D_out]          (b1@W2 + b2) tiled `pack` times, f32.

    Note: for bf16 the fused f32 product is cast once, which compounds
    quantization slightly vs. casting W1/W2 individually (documented tradeoff).
    """
    f32 = jnp.float32
    b1 = jnp.reshape(b1, (1, -1)).astype(f32)
    b2 = jnp.reshape(b2, (1, -1)).astype(f32)
    w_f = jnp.dot(w1.astype(f32), w2.astype(f32), precision=lax.Precision.HIGHEST)
    b_f = jnp.dot(b1, w2.astype(f32), precision=lax.Precision.HIGHEST) + b2
    w_block = jnp.kron(jnp.eye(pack, dtype=f32), w_f).astype(compute_dtype)
    b_packed = jnp.tile(b_f, (1, pack))
    return w_block, b_packed


def _fused_ffn_kernel(x_ref, w_ref, b_ref, o_ref, *, precision):
    # One MXU matmul per tile; bias add in f32 on the VPU; one dense store.
    x = x_ref[...]
    w = w_ref[...]
    if x.dtype != w.dtype:
        x = x.astype(w.dtype)         # in-kernel cast (free); HBM reads keep x's dtype
    acc = jnp.dot(x, w, preferred_element_type=jnp.float32, precision=precision)
    o_ref[...] = (acc + b_ref[...]).astype(o_ref.dtype)


def ffnetwork_apply(x, w_block, b_packed, *, out_dtype=None, block_rows=None,
                    interpret=False):
    """Forward pass y = x @ (W1@W2) + (b1@W2 + b2) as exactly one pallas_call.

    x        : [B, D_in]
    w_block  : [pack*D_in, pack*D_out]   from fuse_ffn_params
    b_packed : [1, pack*D_out]           from fuse_ffn_params
    """
    B, D_in = x.shape
    Kp, Np = w_block.shape
    pack = Kp // D_in
    D_out = Np // pack
    assert Kp == pack * D_in and Np == pack * D_out
    if out_dtype is None:
        out_dtype = x.dtype

    in_item = jnp.dtype(x.dtype).itemsize
    out_item = jnp.dtype(out_dtype).itemsize

    # ---- batch tile selection against a corrected, generation-aware budget ----
    budget = _vmem_budget_bytes()
    resident = 2 * (_vmem_tile_bytes(Kp, Np, w_block.dtype)      # "resident" W/b are
                    + _vmem_tile_bytes(1, Np, b_packed.dtype))   # still double-buffered
    per_packed_row = (2 * _round_up(Kp, 128) * in_item           # double-buffered x slab
                      + 2 * _round_up(Np, 128) * out_item        # double-buffered out slab
                      + _round_up(Np, 128) * 4)                  # f32 accumulator
    max_packed_rows = max(1, (budget - resident) // per_packed_row)
    max_rows = max(pack, max_packed_rows * pack)                 # in unpacked rows

    B8 = _round_up(B, pack)
    if block_rows is None:
        block_rows = _pick_block_rows(B8, max_rows, pack=pack)
    block_rows = max(pack, (min(block_rows, max_rows) // pack) * pack)
    B_pad = _round_up(B8, block_rows)

    x_p = x
    if B_pad != B:
        # TODO(synk): a masked tail tile would avoid this copy for very large
        # ragged batches; here the pad is at most block_rows-1 zero rows.
        x_p = jnp.pad(x, ((0, B_pad - B), (0, 0)))
    x_p = x_p.reshape(B_pad // pack, pack * D_in)                # free bitcast

    grid = (B_pad // block_rows,)
    blk_p = block_rows // pack                                   # packed rows / tile

    cost = pl.CostEstimate(
        flops=2 * B_pad * D_in * D_out,        # useful flops (block-diag zeros excluded)
        transcendentals=0,
        bytes_accessed=(x_p.size * in_item
                        + w_block.size * jnp.dtype(w_block.dtype).itemsize
                        + b_packed.size * 4
                        + B_pad * D_out * out_item),
    )

    precision = (lax.Precision.HIGHEST
                 if (x.dtype == jnp.float32 and w_block.dtype == jnp.float32)
                 else None)

    out_p = pl.pallas_call(
        functools.partial(_fused_ffn_kernel, precision=precision),
        out_shape=jax.ShapeDtypeStruct((B_pad // pack, Np), out_dtype),
        grid=grid,
        in_specs=[
            pl.BlockSpec((blk_p, Kp), lambda i: (i, 0)),   # streamed packed x slab
            pl.BlockSpec((Kp, Np), lambda i: (0, 0)),      # resident block-diag W
            pl.BlockSpec((1, Np), lambda i: (0, 0)),       # resident packed bias (f32)
        ],
        out_specs=pl.BlockSpec((blk_p, Np), lambda i: (i, 0)),   # lane-dense output slab
        compiler_params=pltpu.CompilerParams(
            dimension_semantics=("parallel",),             # megacore-shardable on v7x
            vmem_limit_bytes=budget,
        ),
        cost_estimate=cost,
        interpret=interpret,
    )(x_p, w_block, b_packed)

    out = out_p.reshape(B_pad, D_out)                            # free bitcast
    if B_pad != B:
        out = out[:B]
    return out


def ffnetwork_forward(x, w1, b1, w2, b2, *, compute_dtype=None, **kwargs):
    """Convenience: fuse + apply in one call.  For production, hoist
    fuse_ffn_params out of the hot path and call ffnetwork_apply directly."""
    if compute_dtype is None:
        compute_dtype = x.dtype
    w_block, b_packed = fuse_ffn_params(w1, b1, w2, b2, compute_dtype=compute_dtype)
    return ffnetwork_apply(x, w_block, b_packed, **kwargs)


def init_params(key, input_layers, first_layer_nodes, output_layers,
                dtype=jnp.float32):
    # Deterministic init mimicking nn.Linear's uniform(-1/sqrt(fan_in), 1/sqrt(fan_in)).
    k1, k2, k3, k4 = jax.random.split(key, 4)
    bound1 = 1.0 / jnp.sqrt(input_layers)
    bound2 = 1.0 / jnp.sqrt(first_layer_nodes)
    w1 = jax.random.uniform(k1, (input_layers, first_layer_nodes), dtype, -bound1, bound1)
    b1 = jax.random.uniform(k2, (1, first_layer_nodes), dtype, -bound1, bound1)
    w2 = jax.random.uniform(k3, (first_layer_nodes, output_layers), dtype, -bound2, bound2)
    b2 = jax.random.uniform(k4, (1, output_layers), dtype, -bound2, bound2)
    return w1, b1, w2, b2


if __name__ == "__main__":
    key = jax.random.PRNGKey(0)
    kx, kp = jax.random.split(key)

    # FFNetwork(input_layers=32, output_layers=16, first_layer_nodes=64);
    # batch=512 so the batch grid has 2 steps (block=256) -> exercises the
    # "parallel" batch axis / both v7x TensorCores.
    batch, input_layers, first_layer_nodes, output_layers = 512, 32, 64, 16

    x = jax.random.normal(kx, (batch, input_layers), jnp.float32)
    w1, b1, w2, b2 = init_params(kp, input_layers, first_layer_nodes, output_layers)

    # Reference in plain JAX (same math as the PyTorch forward).
    ref = (x @ w1 + b1) @ w2 + b2

    # f32 path: one-time hoisted fusion, jitted single-pallas_call forward.
    fused_f32 = fuse_ffn_params(w1, b1, w2, b2, compute_dtype=jnp.float32)
    fwd_f32 = jax.jit(lambda xx: ffnetwork_apply(xx, *fused_f32))
    out = jax.block_until_ready(fwd_f32(x))
    assert out.shape == (batch, output_layers)
    assert jnp.allclose(out, ref, atol=1e-5, rtol=1e-5)

    # bf16 weight path (MXU-native on v5e/v6e/v7x); x cast in-kernel, f32 acc.
    fused_bf16 = fuse_ffn_params(w1, b1, w2, b2, compute_dtype=jnp.bfloat16)
    out_bf16 = jax.block_until_ready(ffnetwork_apply(x, *fused_bf16))
    assert out_bf16.shape == (batch, output_layers)
    assert jnp.allclose(out_bf16, ref, atol=5e-2, rtol=5e-2)

    # Ragged batch (tail padded only up to the next multiple of 8 / block).
    xr = x[: batch - 3]
    out_r = jax.block_until_ready(ffnetwork_apply(xr, *fused_f32))
    assert out_r.shape == (batch - 3, output_layers)
    assert jnp.allclose(out_r, ref[: batch - 3], atol=1e-5, rtol=1e-5)

    print("KERNEL_OK")
</pallas_src>

<mosaic_0001>
module attributes {stable_mosaic.version = 11 : i64} {
  func.func @_fused_ffn_kernel(%arg0: i32, %arg1: memref<32x256xf32, #tpu.memory_space<vmem>>, %arg2: memref<256x128xf32, #tpu.memory_space<vmem>>, %arg3: memref<1x128xf32, #tpu.memory_space<vmem>>, %arg4: memref<32x128xf32, #tpu.memory_space<vmem>>) attributes {dimension_semantics = [#tpu.dimension_semantics<parallel>], iteration_bounds = array<i64: 2>, scalar_prefetch = 0 : i64, scratch_operands = 0 : i64, tpu.core_type = #tpu.core_type<tc>, window_params = [{transform_indices = @transform_0, window_bounds = array<i64: 32, 256>}, {pipeline_mode = #tpu.pipeline_mode<synchronous>, transform_indices = @transform_1, window_bounds = array<i64: 256, 128>}, {pipeline_mode = #tpu.pipeline_mode<synchronous>, transform_indices = @transform_2, window_bounds = array<i64: 1, 128>}, {transform_indices = @transform_3, window_bounds = array<i64: 32, 128>}]} {
    %c0 = arith.constant 0 : index
    %c0_0 = arith.constant 0 : index
    %0 = vector.load %arg1[%c0, %c0_0] : memref<32x256xf32, #tpu.memory_space<vmem>>, vector<32x256xf32>
    %c0_1 = arith.constant 0 : index
    %c0_2 = arith.constant 0 : index
    %1 = vector.load %arg2[%c0_1, %c0_2] : memref<256x128xf32, #tpu.memory_space<vmem>>, vector<256x128xf32>
    %cst = arith.constant dense<0.000000e+00> : vector<32x128xf32>
    %2 = tpu.matmul %0, %1, %cst {dimension_numbers = #tpu.dot_dimension_numbers<[1], [0], [0], [1], [0, 0, 1, 1], [], []>, precision = #tpu.contract_precision<fp32>} : vector<32x256xf32>, vector<256x128xf32>, vector<32x128xf32> -> vector<32x128xf32>
    %c0_3 = arith.constant 0 : index
    %c0_4 = arith.constant 0 : index
    %3 = vector.load %arg3[%c0_3, %c0_4] : memref<1x128xf32, #tpu.memory_space<vmem>>, vector<1x128xf32>
    %4 = vector.broadcast %3 : vector<1x128xf32> to vector<32x128xf32>
    %5 = arith.addf %2, %4 : vector<32x128xf32>
    %c0_5 = arith.constant 0 : index
    %c0_6 = arith.constant 0 : index
    %6 = vector.load %arg4[%c0_5, %c0_6] : memref<32x128xf32, #tpu.memory_space<vmem>>, vector<32x128xf32>
    tpu.vector_store %arg4[%c0_5, %c0_6], %5 {strides = array<i32>} : memref<32x128xf32, #tpu.memory_space<vmem>>, vector<32x128xf32>,
    return
  }
  func.func @transform_0(%arg0: i32) -> (i32, i32) {
    %c0_i32 = arith.constant 0 : i32
    %c0_i32_0 = arith.constant 0 : i32
    return %arg0, %c0_i32 : i32, i32
  }
  func.func @transform_1(%arg0: i32) -> (i32, i32) {
    %c0_i32 = arith.constant 0 : i32
    %c0_i32_0 = arith.constant 0 : i32
    %c0_i32_1 = arith.constant 0 : i32
    return %c0_i32, %c0_i32_0 : i32, i32
  }
  func.func @transform_2(%arg0: i32) -> (i32, i32) {
    %c0_i32 = arith.constant 0 : i32
    %c0_i32_0 = arith.constant 0 : i32
    %c0_i32_1 = arith.constant 0 : i32
    return %c0_i32, %c0_i32_0 : i32, i32
  }
  func.func @transform_3(%arg0: i32) -> (i32, i32) {
    %c0_i32 = arith.constant 0 : i32
    %c0_i32_0 = arith.constant 0 : i32
    return %arg0, %c0_i32 : i32, i32
  }
}

</mosaic_0001>

<bundles_post_ra>
// kernel: _lambda_.1
= control target key start
LH: loop header
LB: loop body
LE: loop exit
PB: predicated region body
PF: predicated region fallthrough
CT: control target
= control target key end

     0   :  { %s1199_s12 = smov 0   ;;  %s1931_s0 = inlined_call_operand.vmem [shape: f32[64,256], index: 0, kind: input, shape index: {}]   ;;  %s1932_s1 = inlined_call_operand.vmem [shape: f32[256,128], index: 1, kind: input, shape index: {}]   ;;  %s1933_s2 = inlined_call_operand.vmem [shape: f32[1,128], index: 2, kind: input, shape index: {}]   ;;  %s1934_s3 = inlined_call_operand.vmem [shape: f32[64,128], index: 3, kind: output, shape index: {}]  }
   0x1 LB: > { %s1149_s13 = sadd.s32 4294967295, %s1177_s12   ;;  %p1153_p0 = scmp.ge.s32.totalorder %s1177_s12, 1  ;;  %s1177_s12 = sphi %s1199_s12, %s13_s12  }
   0x2   : > { %p139_p1 = scmp.lt.s32.totalorder %s1177_s12, 3 }
   0x4   : > { %p140_p2 = pnand %p1153_p0, %p139_p1 }
   0x6   : > { %143 = sbr.rel (%p140_p2) target bundleno = 289 (0x121), region = 32 }
   0xb   : > { %v200_v0 = vld [vmem:[%s1932_s1 + $0x78] sm:$0xff]  ;;  %v199_v1 = vld [vmem:[%s1932_s1 + $0x70] sm:$0xff]  ;;  %v198_v2 = vld [vmem:[%s1932_s1 + $0x68] sm:$0xff]  ;;  %s1154_s20 = sshll.u32 %s1149_s13, 2 }
   0xc   : > { %v1216_v3 = vand.u32 4294901760, %v200_v0  ;;  %v1218_v4 = vand.u32 4294901760, %v199_v1  ;;  %v1220_v5 = vand.u32 4294901760, %v198_v2  ;;  %v197_v6 = vld [vmem:[%s1932_s1 + $0x60] sm:$0xff]  ;;  %v196_v7 = vld [vmem:[%s1932_s1 + $0x58] sm:$0xff]  ;;  %v195_v8 = vld [vmem:[%s1932_s1 + $0x50] sm:$0xff] }
   0xd   : > { %v1231_v9 = vand.u32 4294901760, %v197_v6  ;;  %v1233_v10 = vand.u32 4294901760, %v196_v7  ;;  %v1235_v11 = vand.u32 4294901760, %v195_v8  ;;  %v194_v12 = vld [vmem:[%s1932_s1 + $0x48] sm:$0xff]  ;;  %v193_v13 = vld [vmem:[%s1932_s1 + $0x40] sm:$0xff]  ;;  %v192_v18 = vld [vmem:[%s1932_s1 + $0x38] sm:$0xff] }
   0xe   : > { %222 = vmatpush.msra.mxu0 %v1216_v3  ;;  %v1245_v14 = vsub.f32 %v200_v0, %v1216_v3  ;;  %v1248_v15 = vsub.f32 %v199_v1, %v1218_v4  ;;  %469 = vmatpush.msra.mxu3 %v1216_v3  ;;  %v1252_v16 = vsub.f32 %v198_v2, %v1220_v5  ;;  %v1254_v17 = vand.u32 4294901760, %v194_v12  ;;  %p165_p3 = scmp.lt.s32.totalorder %s1154_s20, 7  ;;  %v191_v29 = vld [vmem:[%s1932_s1 + $0x30] sm:$0xff]  ;;  %v190_v36 = vld [vmem:[%s1932_s1 + $0x28] sm:$0xff]  ;;  %v189_v43 = vld [vmem:[%s1932_s1 + $0x20] sm:$0xff] }
   0xf   : > { %v1260_v19 = vsub.f32 %v197_v6, %v1231_v9  ;;  %v1263_v20 = vsub.f32 %v196_v7, %v1233_v10  ;;  %v1265_v21 = vand.u32 4294901760, %v193_v13  ;;  %v1268_v22 = vsub.f32 %v195_v8, %v1235_v11  ;;  %v188_v49 = vld [vmem:[%s1932_s1 + $0x18] sm:$0xff]  ;;  %v187_v55 = vld [vmem:[%s1932_s1 + $0x10] sm:$0xff]  ;;  %v186_v62 = vld [vmem:[%s1932_s1 + $0x8] sm:$0xff] }
  0x10   : > { %224 = vmatpush.msra.mxu0 %v1218_v4  ;;  %401 = vmatpush.msra.mxu2 %v1245_v14  ;;  %v288_v23 = vand.u32 4294901760, %v1245_v14  ;;  %v1949_v24 = vand.u32 4294901760, %v1248_v15  ;;  %v1947_v25 = vand.u32 4294901760, %v1252_v16  ;;  %s2005_s20 = smov (!%p165_p3, %s1154_s20), 7  ;;  %v1279_v27 = vand.u32 4294901760, %v192_v18  ;;  %v216_v6 = vld [vmem:[%s1932_s1 + $0xf8] sm:$0xff] }
  0x11   : > { %471 = vmatpush.msra.mxu3 %v1218_v4  ;;  %v1945_v26 = vand.u32 4294901760, %v1260_v19  ;;  %v1282_v28 = vsub.f32 %v194_v12, %v1254_v17  ;;  %v1943_v33 = vand.u32 4294901760, %v1263_v20  ;;  %v1942_v34 = vand.u32 4294901760, %v1268_v22  ;;  %s1161_s10 = sshll.u32 %s2005_s20, 4  ;;  %v185_v12 = vld [vmem:[%s1932_s1] sm:$0xff]  ;;  %s1158_s8 = sshll.u32 %s2005_s20, 3 }
  0x12   : > { %226 = vmatpush.msra.mxu0 %v1220_v5  ;;  %404 = vmatpush.msra.mxu2 %v1248_v15  ;;  %v289_v30 = vsub.f32 %v1245_v14, %v288_v23  ;;  %v295_v31 = vsub.f32 %v1248_v15, %v1949_v24  ;;  %v301_v32 = vsub.f32 %v1252_v16, %v1947_v25  ;;  %v1313_v40 = vand.u32 4294901760, %v191_v29  ;;  %s1332_s16 = scalar_lea.vmem %s1931_s0, %s1161_s10  ;;  %v210_v24 = vld [vmem:[%s1932_s1 + $0xc8] sm:$0xff]  ;;  %v209_v14 = vld [vmem:[%s1932_s1 + $0xc0] sm:$0xff]  ;;  %s1922_s11 = scalar_lea.vmem %s1934_s3, %s1158_s8 }
  0x13   : > { %473 = vmatpush.msra.mxu3 %v1220_v5  ;;  %v1302_v35 = vsub.f32 %v193_v13, %v1265_v21  ;;  %v307_v39 = vsub.f32 %v1260_v19, %v1945_v26  ;;  %v1941_v41 = vand.u32 4294901760, %v1282_v28  ;;  %v1318_v42 = vsub.f32 %v192_v18, %v1279_v27  ;;  %v177_v56 = vld [vmem:[%s1332_s16] sm:$0xff] }
  0x14   : > { %228 = vmatpush.msra.mxu0 %v1231_v9  ;;  %v290_v37 = vand.u32 4294901760, %v289_v30  ;;  %407 = vmatpush.msra.mxu2 %v1252_v16  ;;  %v296_v38 = vand.u32 4294901760, %v295_v31  ;;  %v302_v44 = vand.u32 4294901760, %v301_v32  ;;  %v313_v45 = vsub.f32 %v1263_v20, %v1943_v33  ;;  %v181_v33 = vld [vmem:[%s1332_s16 + $0x20] sm:$0xff] }
  0x15   : > { %475 = vmatpush.msra.mxu3 %v1231_v9  ;;  %v1327_v46 = vand.u32 4294901760, %v190_v36  ;;  %v319_v47 = vsub.f32 %v1268_v22, %v1942_v34  ;;  %v1939_v48 = vand.u32 4294901760, %v1302_v35  ;;  %v308_v50 = vand.u32 4294901760, %v307_v39 }
  0x16   : > { %230 = vmatpush.msra.mxu0 %v1233_v10  ;;  %291 = vmatpush.msra.mxu1 %v290_v37  ;;  %v1344_v51 = vand.u32 4294901760, %v189_v43  ;;  %v1347_v52 = vsub.f32 %v191_v29, %v1313_v40  ;;  %v325_v53 = vsub.f32 %v1282_v28, %v1941_v41  ;;  %v1938_v54 = vand.u32 4294901760, %v1318_v42 }
  0x17   : > { %410 = vmatpush.msra.mxu2 %v1260_v19  ;;  %477 = vmatpush.msra.mxu3 %v1233_v10  ;;  %v314_v57 = vand.u32 4294901760, %v313_v45  ;;  %v1360_v58 = vand.u32 4294901760, %v188_v49  ;;  %v1363_v59 = vsub.f32 %v190_v36, %v1327_v46  ;;  %v320_v60 = vand.u32 4294901760, %v319_v47  ;;  %v179_v36 = vld [vmem:[%s1332_s16 + $0x10] sm:$0xff] }
  0x18   : > { %232 = vmatpush.msra.mxu0 %v1235_v11  ;;  %297 = vmatpush.msra.mxu1 %v296_v38  ;;  %v331_v61 = vsub.f32 %v1302_v35, %v1939_v48  ;;  %v1374_v63 = vand.u32 4294901760, %v187_v55  ;;  %v1937_v0 = vand.u32 4294901760, %v1347_v52  ;;  %v1378_v1 = vsub.f32 %v189_v43, %v1344_v51 }
  0x19   : > { %413 = vmatpush.msra.mxu2 %v1263_v20  ;;  %479 = vmatpush.msra.mxu3 %v1235_v11  ;;  %v1380_v2 = vand.u32 4294901760, %v177_v56  ;;  %v326_v7 = vand.u32 4294901760, %v325_v53  ;;  %v337_v8 = vsub.f32 %v1318_v42, %v1938_v54  ;;  %v1394_v13 = vand.u32 4294901760, %v186_v62 }
  0x1a   : > { %234 = vmatpush.msra.mxu0 %v1254_v17  ;;  %303 = vmatpush.msra.mxu1 %v302_v44  ;;  %v1935_v18 = vand.u32 4294901760, %v1363_v59  ;;  %v1398_v29 = vsub.f32 %v188_v49, %v1360_v58  ;;  %v332_v31 = vand.u32 4294901760, %v331_v61  ;;  %v1405_v32 = vand.u32 4294901760, %v216_v6  ;;  %v215_v44 = vld [vmem:[%s1932_s1 + $0xf0] sm:$0xff] }
  0x1b   : > { %416 = vmatpush.msra.mxu2 %v1268_v22  ;;  %481 = vmatpush.msra.mxu3 %v1254_v17  ;;  %v1401_v30 = vsub.f32 %v177_v56, %v1380_v2  ;;  %v343_v37 = vsub.f32 %v1347_v52, %v1937_v0  ;;  %v1412_v38 = vand.u32 4294901760, %v185_v12  ;;  %v1936_v39 = vand.u32 4294901760, %v1378_v1  ;;  %v214_v56 = vld [vmem:[%s1932_s1 + $0xe8] sm:$0xff] }
  0x1c   : > { %236 = vmatpush.msra.mxu0 %v1265_v21  ;;  %309 = vmatpush.msra.mxu1 %v308_v50  ;;  %v1416_v43 = vsub.f32 %v187_v55, %v1374_v63  ;;  %v338_v45 = vand.u32 4294901760, %v337_v8  ;;  %v349_v49 = vsub.f32 %v1363_v59, %v1935_v18  ;;  %v1940_v50 = vand.u32 4294901760, %v1398_v29 }
  0x1d   : > { %419 = vmatpush.msra.mxu2 %v1282_v28  ;;  %483 = vmatpush.msra.mxu3 %v1265_v21  ;;  %1962 = vst [vmem:[#allocation2_spill] sm:$0xff] %v1412_v38  ;;  %v1948_v47 = vand.u32 4294901760, %v1401_v30  ;;  %v1430_v53 = vsub.f32 %v186_v62, %v1394_v13  ;;  %v1432_v55 = vand.u32 4294901760, %v179_v36  ;;  %v344_v61 = vand.u32 4294901760, %v343_v37 }
  0x1e   : > { %238 = vmatpush.msra.mxu0 %v1279_v27  ;;  %315 = vmatpush.msra.mxu1 %v314_v57  ;;  %v1439_v57 = vand.u32 4294901760, %v215_v44  ;;  %v355_v62 = vsub.f32 %v1378_v1, %v1936_v39  ;;  %v1450_v8 = vsub.f32 %v185_v12, %v1412_v38  ;;  %v1457_v18 = vand.u32 4294901760, %v214_v56 }
  0x1f   : > { %422 = vmatpush.msra.mxu2 %v1302_v35  ;;  %485 = vmatpush.msra.mxu3 %v1279_v27  ;;  %v350_v37 = vand.u32 4294901760, %v349_v49  ;;  %v361_v12 = vsub.f32 %v1398_v29, %v1940_v50  ;;  %v1946_v39 = vand.u32 4294901760, %v1430_v53  ;;  %v1468_v0 = vsub.f32 %v179_v36, %v1432_v55 }
  0x20   : > { %240 = vmatpush.msra.mxu0 %v1313_v40  ;;  %321 = vmatpush.msra.mxu1 %v320_v60  ;;  %v1442_v60 = vsub.f32 %v216_v6, %v1405_v32  ;;  %v256_v6 = vsub.f32 %v1401_v30, %v1948_v47  ;;  %1963 = vst [vmem:[#allocation3_spill] sm:$0xff] %v1457_v18  ;;  %v356_v49 = vand.u32 4294901760, %v355_v62  ;;  %v1951_v50 = vand.u32 4294901760, %v1450_v8 }
  0x21   : > { %425 = vmatpush.msra.mxu2 %v1318_v42  ;;  %487 = vmatpush.msra.mxu3 %v1313_v40  ;;  %v1474_v48 = vsub.f32 %v215_v44, %v1439_v57  ;;  %v1489_v34 = vsub.f32 %v214_v56, %v1457_v18  ;;  %v373_v62 = vsub.f32 %v1430_v53, %v1946_v39  ;;  %v1515_v47 = vand.u32 4294901760, %v181_v33 }
  0x22   : > { %242 = vmatpush.msra.mxu0 %v1327_v46  ;;  %327 = vmatpush.msra.mxu1 %v326_v7  ;;  %v1944_v7 = vand.u32 4294901760, %v1416_v43  ;;  %v1950_v54 = vand.u32 4294901760, %v1442_v60  ;;  %v257_v44 = vand.u32 4294901760, %v256_v6  ;;  %v211_v6 = vld [vmem:[%s1932_s1 + $0xd0] sm:$0xff]  ;;  %v379_v39 = vsub.f32 %v1450_v8, %v1951_v50 }
  0x23   : > { %428 = vmatpush.msra.mxu2 %v1347_v52  ;;  %489 = vmatpush.msra.mxu3 %v1327_v46 }
  0x24   : > { %244 = vmatpush.msra.mxu0 %v1344_v51  ;;  %333 = vmatpush.msra.mxu1 %v332_v31  ;;  %v213_v31 = vld [vmem:[%s1932_s1 + $0xe0] sm:$0xff]  ;;  %v367_v36 = vsub.f32 %v1416_v43, %v1944_v7  ;;  %v1953_v7 = vand.u32 4294901760, %v1468_v0  ;;  %v723_v56 = vsub.f32 %v1442_v60, %v1950_v54  ;;  %v1537_v54 = vand.u32 4294901760, %v210_v24 }
  0x25   : > { %431 = vmatpush.msra.mxu2 %v1363_v59  ;;  %491 = vmatpush.msra.mxu3 %v1344_v51  ;;  %v1484_v41 = vand.u32 4294901760, %v213_v31 }
  0x26   : > { %246 = vmatpush.msra.mxu0 %v1360_v58  ;;  %339 = vmatpush.msra.mxu1 %v338_v45  ;;  %v212_v45 = vld [vmem:[%s1932_s1 + $0xd8] sm:$0xff] }
  0x27   : > { %434 = vmatpush.msra.mxu2 %v1378_v1  ;;  %493 = vmatpush.msra.mxu3 %v1360_v58  ;;  %v1497_v26 = vand.u32 4294901760, %v212_v45  ;;  %v1513_v25 = vsub.f32 %v213_v31, %v1484_v41  ;;  %v264_v31 = vsub.f32 %v1468_v0, %v1953_v7  ;;  %v1966_v7 = vand.u32 4294901760, %v1489_v34 }
  0x28   : > { %248 = vmatpush.msra.mxu0 %v1374_v63  ;;  %345 = vmatpush.msra.mxu1 %v344_v61  ;;  %v362_v61 = vand.u32 4294901760, %v361_v12  ;;  %v368_v12 = vand.u32 4294901760, %v367_v36  ;;  %v374_v36 = vand.u32 4294901760, %v373_v62 }
  0x29   : > { %437 = vmatpush.msra.mxu2 %v1398_v29  ;;  %495 = vmatpush.msra.mxu3 %v1374_v63  ;;  %v1530_v50 = vsub.f32 %v212_v45, %v1497_v26  ;;  %v380_v45 = vand.u32 4294901760, %v379_v39  ;;  %v1955_v62 = vand.u32 4294901760, %v1513_v25 }
  0x2a   : > { %250 = vmatpush.msra.mxu0 %v1394_v13  ;;  %351 = vmatpush.msra.mxu1 %v350_v37  ;;  %v1952_v37 = vand.u32 4294901760, %v1474_v48 }
  0x2b   : > { %440 = vmatpush.msra.mxu2 %v1416_v43  ;;  %497 = vmatpush.msra.mxu3 %v1394_v13 }
  0x2c   : > { %252 = vmatpush.msra.mxu0 %v1412_v38  ;;  %357 = vmatpush.msra.mxu1 %v356_v49  ;;  %v1522_v49 = vand.u32 4294901760, %v211_v6 }
  0x2d   : > { %258 = vmatmul.f32.vlgmr.msra.gmra.mxu0 %v257_v44  ;;  %443 = vmatpush.msra.mxu2 %v1430_v53  ;;  %v724_v44 = vand.u32 4294901760, %v723_v56  ;;  %v1546_v56 = vsub.f32 %v181_v33, %v1515_v47  ;;  %v265_v33 = vand.u32 4294901760, %v264_v31 }
  0x2e   : > { %363 = vmatpush.msra.mxu1 %v362_v61  ;;  %528 = vmatpush.msrb.mxu0 %v288_v23  ;;  %v729_v61 = vsub.f32 %v1474_v48, %v1952_v37  ;;  %v1964_v23 = vand.u32 4294901760, %v1248_v15  ;;  %v1965_v37 = vand.u32 4294901760, %v1401_v30  ;;  %v208_v15 = vld [vmem:[%s1932_s1 + $0xb8] sm:$0xff] }
  0x2f   : > { %446 = vmatpush.msra.mxu2 %v1450_v8  ;;  %499 = vmatpush.msra.mxu3 %v1412_v38  ;;  %v735_v38 = vsub.f32 %v1489_v34, %v1966_v7  ;;  %v1575_v39 = vand.u32 4294901760, %v208_v15 }
  0x30   : > { %369 = vmatpush.msra.mxu1 %v368_v12  ;;  %532 = vmatpush.msrb.mxu0 %v1964_v23  ;;  %v1555_v12 = vsub.f32 %v211_v6, %v1522_v49  ;;  %v1562_v23 = vand.u32 4294901760, %v209_v14  ;;  %v730_v7 = vand.u32 4294901760, %v729_v61  ;;  %v1567_v6 = vsub.f32 %v210_v24, %v1537_v54 }
  0x31   : > { %449 = vmatmul.f32.vlgmr.msra.gmra.mxu2 %v1401_v30  ;;  %503 = vmatmul.f32.vlgmr.msra.gmra.mxu3 %v1965_v37  ;;  %v1967_v30 = vand.u32 4294901760, %v1252_v16  ;;  %v183_v37 = vld [vmem:[%s1332_s16 + $0x30] sm:$0xff]  ;;  %v736_v24 = vand.u32 4294901760, %v735_v38  ;;  %v1607_v61 = vsub.f32 %v208_v15, %v1575_v39 }
  0x32   : > { %656 = vmatpush.msrb.mxu2 %v1405_v32  ;;  %375 = vmatpush.msra.mxu1 %v374_v36  ;;  %v741_v36 = vsub.f32 %v1513_v25, %v1955_v62  ;;  %v207_v16 = vld [vmem:[%s1932_s1 + $0xb0] sm:$0xff]  ;;  %v1589_v62 = vsub.f32 %v209_v14, %v1562_v23  ;;  %v1591_v31 = vand.u32 4294901760, %v183_v37 }
  0x33   : > { %536 = vmatpush.msrb.mxu0 %v1967_v30  ;;  %725 = vmatpush.msrb.mxu3 %v724_v44  ;;  %v1968_v44 = vand.u32 4294901760, %v1260_v19  ;;  %v206_v19 = vld [vmem:[%s1932_s1 + $0xa8] sm:$0xff] }
  0x34   : > { %658 = vmatpush.msrb.mxu2 %v1439_v57  ;;  %381 = vmatpush.msra.mxu1 %v380_v45  ;;  %v1969_v45 = vand.u32 4294901760, %v1530_v50  ;;  %v742_v14 = vand.u32 4294901760, %v741_v36  ;;  %v1976_v36 = vand.u32 4294901760, %v1468_v0 }
  0x35   : > { %540 = vmatpush.msrb.mxu0 %v1968_v44  ;;  %383 = vmatmul.f32.vlgmr.msra.gmra.mxu1 %v1380_v2  ;;  %v1971_v44 = vand.u32 4294901760, %v1546_v56 }
  0x36   : > { %266 = vmatmul.f32.gmra.mxu0 %v265_v33  ;;  %607 = vmatpush.msrb.mxu1 %v1216_v3  ;;  %v747_v30 = vsub.f32 %v1530_v50, %v1969_v45  ;;  %v1598_v33 = vand.u32 4294901760, %v207_v16  ;;  %v1970_v3 = vand.u32 4294901760, %v1263_v20  ;;  %v1973_v20 = vand.u32 4294901760, %v1268_v22  ;;  %v204_v22 = vld [vmem:[%s1932_s1 + $0x98] sm:$0xff] }
  0x37   : > { %660 = vmatpush.msrb.mxu2 %v1457_v18  ;;  %731 = vmatpush.msrb.mxu3 %v730_v7  ;;  %v272_v45 = vsub.f32 %v1546_v56, %v1971_v44  ;;  %v1972_v7 = vand.u32 4294901760, %v1555_v12  ;;  %v1613_v18 = vand.u32 4294901760, %v206_v19 }
  0x38   : > { %544 = vmatpush.msrb.mxu0 %v1970_v3  ;;  %609 = vmatpush.msrb.mxu1 %v1218_v4  ;;  %v205_v4 = vld [vmem:[%s1932_s1 + $0xa0] sm:$0xff]  ;;  %v748_v15 = vand.u32 4294901760, %v747_v30  ;;  %v1974_v3 = vand.u32 4294901760, %v1567_v6  ;;  %v1975_v30 = vand.u32 4294901760, %v1282_v28  ;;  %v1977_v28 = vand.u32 4294901760, %v1589_v62 }
  0x39   : > { %662 = vmatpush.msrb.mxu2 %v1484_v41  ;;  %737 = vmatpush.msrb.mxu3 %v736_v24  ;;  %v753_v38 = vsub.f32 %v1555_v12, %v1972_v7  ;;  %v1623_v24 = vsub.f32 %v183_v37, %v1591_v31  ;;  %v1631_v7 = vsub.f32 %v207_v16, %v1598_v33  ;;  %v273_v37 = vand.u32 4294901760, %v272_v45 }
  0x3a   : > { %548 = vmatpush.msrb.mxu0 %v1973_v20  ;;  %454 = vmatmul.f32.gmra.mxu2 %v1468_v0  ;;  %v759_v44 = vsub.f32 %v1567_v6, %v1974_v3  ;;  %v1639_v20 = vand.u32 4294901760, %v205_v4  ;;  %v1645_v3 = vsub.f32 %v206_v19, %v1613_v18  ;;  %v203_v0 = vld [vmem:[%s1932_s1 + $0x90] sm:$0xff] }
  0x3b   : > { %611 = vmatpush.msrb.mxu1 %v1220_v5  ;;  %664 = vmatpush.msrb.mxu2 %v1497_v26  ;;  %v1958_v5 = vand.u32 4294901760, %v1607_v61  ;;  %v754_v16 = vand.u32 4294901760, %v753_v38  ;;  %v1960_v45 = vand.u32 4294901760, %v1623_v24  ;;  %v1959_v38 = vand.u32 4294901760, %v1631_v7 }
  0x3c   : > { %743 = vmatpush.msrb.mxu3 %v742_v14  ;;  %552 = vmatpush.msrb.mxu0 %v1975_v30  ;;  %v765_v14 = vsub.f32 %v1589_v62, %v1977_v28  ;;  %v1652_v30 = vand.u32 4294901760, %v204_v22  ;;  %v760_v19 = vand.u32 4294901760, %v759_v44  ;;  %v1961_v44 = vand.u32 4294901760, %v1645_v3 }
  0x3d   : > { %509 = vmatmul.f32.gmra.mxu3 %v1976_v36  ;;  %613 = vmatpush.msrb.mxu1 %v1231_v9  ;;  %v1978_v9 = vand.u32 4294901760, %v1302_v35  ;;  %v1666_v36 = vsub.f32 %v205_v4, %v1639_v20  ;;  %v202_v35 = vld [vmem:[%s1932_s1 + $0x88] sm:$0xff]  ;;  %v1673_v28 = vand.u32 4294901760, %v203_v0  ;;  %v280_v4 = vsub.f32 %v1623_v24, %v1960_v45 }
  0x3e   : > { %666 = vmatpush.msrb.mxu2 %v1522_v49  ;;  %749 = vmatpush.msrb.mxu3 %v748_v15  ;;  %v771_v15 = vsub.f32 %v1607_v61, %v1958_v5  ;;  %v178_v5 = vld [vmem:[%s1332_s16 + $0x8] sm:$0xff] }
  0x3f   : > { %556 = vmatpush.msrb.mxu0 %v1978_v9  ;;  %387 = vmatmul.f32.gmra.mxu1 %v1432_v55  ;;  %v1682_v9 = vsub.f32 %v204_v22, %v1652_v30 }
  0x40   : > { %274 = vmatmul.f32.gmra.mxu0 %v273_v37  ;;  %615 = vmatpush.msrb.mxu1 %v1233_v10  ;;  %v1979_v10 = vand.u32 4294901760, %v1318_v42  ;;  %v766_v37 = vand.u32 4294901760, %v765_v14  ;;  %v1692_v42 = vand.u32 4294901760, %v202_v35  ;;  %v1980_v14 = vand.u32 4294901760, %v1347_v52 }
  0x41   : > { %668 = vmatpush.msrb.mxu2 %v1537_v54  ;;  %755 = vmatpush.msrb.mxu3 %v754_v16  ;;  %v201_v16 = vld [vmem:[%s1932_s1 + $0x80] sm:$0xff]  ;;  %v772_v22 = vand.u32 4294901760, %v771_v15  ;;  %v1708_v52 = vand.u32 4294901760, %v178_v5  ;;  %v1981_v15 = vand.u32 4294901760, %v1363_v59 }
  0x42   : > { %560 = vmatpush.msrb.mxu0 %v1979_v10  ;;  %617 = vmatpush.msrb.mxu1 %v1235_v11  ;;  %v777_v11 = vsub.f32 %v1631_v7, %v1959_v38  ;;  %v1704_v38 = vsub.f32 %v203_v0, %v1673_v28  ;;  %v1706_v45 = vand.u32 4294901760, %v201_v16  ;;  %v1982_v10 = vand.u32 4294901760, %v1546_v56 }
  0x43   : > { %670 = vmatpush.msrb.mxu2 %v1562_v23  ;;  %761 = vmatpush.msrb.mxu3 %v760_v19  ;;  %v783_v19 = vsub.f32 %v1645_v3, %v1961_v44  ;;  %v1717_v0 = vsub.f32 %v202_v35, %v1692_v42 }
  0x44   : > { %564 = vmatpush.msrb.mxu0 %v1980_v14  ;;  %459 = vmatmul.f32.gmra.mxu2 %v1546_v56  ;;  %v281_v14 = vand.u32 4294901760, %v280_v4  ;;  %v778_v44 = vand.u32 4294901760, %v777_v11  ;;  %v1984_v4 = vand.u32 4294901760, %v1378_v1  ;;  %v1728_v11 = vsub.f32 %v178_v5, %v1708_v52 }
  0x45   : > { %619 = vmatpush.msrb.mxu1 %v1254_v17  ;;  %672 = vmatpush.msrb.mxu2 %v1575_v39  ;;  %v794_v17 = vand.u32 4294901760, %v1682_v9  ;;  %v784_v56 = vand.u32 4294901760, %v783_v19  ;;  %v1731_v35 = vsub.f32 %v201_v16, %v1706_v45  ;;  %v806_v1 = vand.u32 4294901760, %v1717_v0 }
  0x46   : > { %767 = vmatpush.msrb.mxu3 %v766_v37  ;;  %568 = vmatpush.msrb.mxu0 %v1981_v15  ;;  %v1983_v37 = vand.u32 4294901760, %v1666_v36  ;;  %v1985_v19 = vand.u32 4294901760, %v1398_v29  ;;  %v689_v16 = vand.u32 4294901760, %v1728_v11  ;;  %v1986_v15 = vand.u32 4294901760, %v1416_v43 }
  0x47   : > { %515 = vmatmul.f32.gmra.mxu3 %v1982_v10  ;;  %621 = vmatpush.msrb.mxu1 %v1265_v21  ;;  %v800_v21 = vand.u32 4294901760, %v1704_v38  ;;  %v180_v10 = vld [vmem:[%s1332_s16 + $0x18] sm:$0xff]  ;;  %v1988_v43 = vand.u32 4294901760, %v1623_v24 }
  0x48   : > { %674 = vmatpush.msrb.mxu2 %v1598_v33  ;;  %773 = vmatpush.msrb.mxu3 %v772_v22  ;;  %v789_v59 = vsub.f32 %v1666_v36, %v1983_v37  ;;  %v795_v22 = vsub.f32 %v1682_v9, %v794_v17  ;;  %v1987_v37 = vand.u32 4294901760, %v1430_v53 }
  0x49   : > { %572 = vmatpush.msrb.mxu0 %v1984_v4  ;;  %391 = vmatmul.f32.gmra.mxu1 %v1515_v47 }
  0x4a   : > { %282 = vmatmul.f32.gmra.mxu0 %v281_v14  ;;  %623 = vmatpush.msrb.mxu1 %v1279_v27  ;;  %v790_v5 = vand.u32 4294901760, %v789_v59  ;;  %v801_v27 = vsub.f32 %v1704_v38, %v800_v21  ;;  %v796_v29 = vand.u32 4294901760, %v795_v22  ;;  %v1752_v14 = vand.u32 4294901760, %v180_v10 }
  0x4b   : > { %676 = vmatpush.msrb.mxu2 %v1613_v18  ;;  %779 = vmatpush.msrb.mxu3 %v778_v44  ;;  %v812_v44 = vand.u32 4294901760, %v1731_v35 }
  0x4c   : > { %576 = vmatpush.msrb.mxu0 %v1985_v19  ;;  %625 = vmatpush.msrb.mxu1 %v1313_v40  ;;  %v807_v40 = vsub.f32 %v1717_v0, %v806_v1  ;;  %v802_v59 = vand.u32 4294901760, %v801_v27  ;;  %v1772_v53 = vsub.f32 %v180_v10, %v1752_v14  ;;  %v182_v19 = vld [vmem:[%s1332_s16 + $0x28] sm:$0xff]  ;;  %v1990_v10 = vand.u32 4294901760, %v1442_v60 }
  0x4d   : > { %678 = vmatpush.msrb.mxu2 %v1639_v20  ;;  %785 = vmatpush.msrb.mxu3 %v784_v56  ;;  %v813_v4 = vsub.f32 %v1731_v35, %v812_v44 }
  0x4e   : > { %580 = vmatpush.msrb.mxu0 %v1986_v15  ;;  %464 = vmatmul.f32.gmra.mxu2 %v1623_v24  ;;  %v1989_v24 = vand.u32 4294901760, %v1450_v8  ;;  %v697_v8 = vand.u32 4294901760, %v1772_v53  ;;  %v1993_v15 = vand.u32 4294901760, %v1489_v34 }
  0x4f   : > { %627 = vmatpush.msrb.mxu1 %v1327_v46  ;;  %680 = vmatpush.msrb.mxu2 %v1652_v30  ;;  %v690_v46 = vsub.f32 %v1728_v11, %v689_v16  ;;  %v814_v22 = vand.u32 4294901760, %v813_v4 }
  0x50   : > { %791 = vmatpush.msrb.mxu3 %v790_v5  ;;  %584 = vmatpush.msrb.mxu0 %v1987_v37  ;;  %v1991_v5 = vld [vmem:[#allocation2_spill] sm:$0xff] }
  0x51   : > { %521 = vmatmul.f32.gmra.mxu3 %v1988_v43  ;;  %629 = vmatpush.msrb.mxu1 %v1344_v51  ;;  %v808_v51 = vand.u32 4294901760, %v807_v40  ;;  %v691_v56 = vand.u32 4294901760, %v690_v46  ;;  %v1994_v40 = vand.u32 4294901760, %v1513_v25  ;;  %v1998_v43 = vand.u32 4294901760, %v1567_v6 }
  0x52   : > { %682 = vmatpush.msrb.mxu2 %v1673_v28  ;;  %797 = vmatpush.msrb.mxu3 %v796_v29 }
  0x53   : > { %588 = vmatpush.msrb.mxu0 %v1989_v24  ;;  %395 = vmatmul.f32.gmra.mxu1 %v1591_v31 }
  0x54   : > { %590 = vmatmul.f32.vlgmr.msrb.gmra.mxu0 %v1380_v2  ;;  %631 = vmatpush.msrb.mxu1 %v1360_v58  ;;  %v1787_v58 = vand.u32 4294901760, %v182_v19 }
  0x55   : > { %684 = vmatpush.msrb.mxu2 %v1692_v42  ;;  %803 = vmatpush.msrb.mxu3 %v802_v59 }
  0x56   : > { %835 = vmatpush.msra.mxu0 %v1442_v60  ;;  %633 = vmatpush.msrb.mxu1 %v1374_v63  ;;  %v698_v63 = vsub.f32 %v1772_v53, %v697_v8  ;;  %v1801_v27 = vsub.f32 %v182_v19, %v1787_v58 }
  0x57   : > { %686 = vmatpush.msrb.mxu2 %v1706_v45  ;;  %809 = vmatpush.msrb.mxu3 %v808_v51 }
  0x58   : > { %838 = vmatpush.msra.mxu0 %v1474_v48  ;;  %635 = vmatpush.msrb.mxu1 %v1394_v13  ;;  %v1992_v13 = vand.u32 4294901760, %v1474_v48  ;;  %v699_v60 = vand.u32 4294901760, %v698_v63  ;;  %v184_v48 = vld [vmem:[%s1332_s16 + $0x38] sm:$0xff]  ;;  %v705_v29 = vand.u32 4294901760, %v1801_v27 }
  0x59   : > { %692 = vmatmul.f32.vlgmr.msrb.gmra.mxu2 %v691_v56  ;;  %815 = vmatpush.msrb.mxu3 %v814_v22 }
  0x5a   : > { %962 = vmatpush.msra.mxu2 %v1990_v10  ;;  %841 = vmatpush.msra.mxu0 %v1489_v34  ;;  %v1996_v34 = vand.u32 4294901760, %v1530_v50 }
  0x5b   : > { %637 = vmatpush.msrb.mxu1 %v1991_v5  ;;  %817 = vmatmul.f32.vlgmr.msrb.gmra.mxu3 %v1708_v52 }
  0x5c   : > { %966 = vmatpush.msra.mxu2 %v1992_v13  ;;  %1041 = vmatpush.msra.mxu3 %v1405_v32 }
  0x5d   : > { %844 = vmatpush.msra.mxu0 %v1513_v25  ;;  %639 = vmatmul.f32.vlgmr.msrb.gmra.mxu1 %v1380_v2  ;;  %v1995_v2 = vld [vmem:[#allocation3_spill] sm:$0xff]  ;;  %v706_v25 = vsub.f32 %v1801_v27, %v705_v29 }
  0x5e   : > { %594 = vmatmul.f32.gmra.mxu0 %v1432_v55  ;;  %903 = vmatpush.msra.mxu1 %v1405_v32  ;;  %v1818_v32 = vand.u32 4294901760, %v184_v48 }
  0x5f   : > { %970 = vmatpush.msra.mxu2 %v1993_v15  ;;  %1043 = vmatpush.msra.mxu3 %v1439_v57  ;;  %v707_v37 = vand.u32 4294901760, %v706_v25 }
  0x60   : > { %847 = vmatpush.msra.mxu0 %v1530_v50  ;;  %905 = vmatpush.msra.mxu1 %v1439_v57  ;;  %v1997_v57 = vand.u32 4294901760, %v1555_v12  ;;  %v1834_v50 = vsub.f32 %v184_v48, %v1818_v32 }
  0x61   : > { %974 = vmatpush.msra.mxu2 %v1994_v40  ;;  %1045 = vmatpush.msra.mxu3 %v1995_v2 }
  0x62   : > { %850 = vmatpush.msra.mxu0 %v1555_v12  ;;  %700 = vmatmul.f32.gmra.mxu2 %v699_v60  ;;  %v1999_v12 = vand.u32 4294901760, %v1589_v62 }
  0x63   : > { %907 = vmatpush.msra.mxu1 %v1995_v2  ;;  %978 = vmatpush.msra.mxu2 %v1996_v34 }
  0x64   : > { %1047 = vmatpush.msra.mxu3 %v1484_v41  ;;  %853 = vmatpush.msra.mxu0 %v1567_v6 }
  0x65   : > { %821 = vmatmul.f32.gmra.mxu3 %v1752_v14  ;;  %909 = vmatpush.msra.mxu1 %v1484_v41  ;;  %v713_v41 = vand.u32 4294901760, %v1834_v50 }
  0x66   : > { %982 = vmatpush.msra.mxu2 %v1997_v57  ;;  %1049 = vmatpush.msra.mxu3 %v1497_v26 }
  0x67   : > { %856 = vmatpush.msra.mxu0 %v1589_v62  ;;  %643 = vmatmul.f32.gmra.mxu1 %v1432_v55  ;;  %v714_v55 = vsub.f32 %v1834_v50, %v713_v41  ;;  %v2002_v62 = vand.u32 4294901760, %v1645_v3 }
  0x68   : > { %598 = vmatmul.f32.gmra.mxu0 %v1515_v47  ;;  %911 = vmatpush.msra.mxu1 %v1497_v26  ;;  %v2000_v26 = vand.u32 4294901760, %v1607_v61 }
  0x69   : > { %986 = vmatpush.msra.mxu2 %v1998_v43  ;;  %1051 = vmatpush.msra.mxu3 %v1522_v49 }
  0x6a   : > { %859 = vmatpush.msra.mxu0 %v1607_v61  ;;  %913 = vmatpush.msra.mxu1 %v1522_v49  ;;  %v2001_v49 = vand.u32 4294901760, %v1631_v7 }
  0x6b   : > { %990 = vmatpush.msra.mxu2 %v1999_v12  ;;  %1053 = vmatpush.msra.mxu3 %v1537_v54 }
  0x6c   : > { %862 = vmatpush.msra.mxu0 %v1631_v7  ;;  %708 = vmatmul.f32.gmra.mxu2 %v707_v37 }
  0x6d   : > { %915 = vmatpush.msra.mxu1 %v1537_v54  ;;  %994 = vmatpush.msra.mxu2 %v2000_v26  ;;  %v715_v54 = vand.u32 4294901760, %v714_v55 }
  0x6e   : > { %1055 = vmatpush.msra.mxu3 %v1562_v23  ;;  %865 = vmatpush.msra.mxu0 %v1645_v3 }
  0x6f   : > { %825 = vmatmul.f32.gmra.mxu3 %v1787_v58  ;;  %917 = vmatpush.msra.mxu1 %v1562_v23  ;;  %v2003_v23 = vand.u32 4294901760, %v1666_v36 }
  0x70   : > { %998 = vmatpush.msra.mxu2 %v2001_v49  ;;  %1057 = vmatpush.msra.mxu3 %v1575_v39 }
  0x71   : > { %868 = vmatpush.msra.mxu0 %v1666_v36  ;;  %647 = vmatmul.f32.gmra.mxu1 %v1515_v47 }
  0x72   : > { %602 = vmatmul.f32.gmra.mxu0 %v1591_v31  ;;  %919 = vmatpush.msra.mxu1 %v1575_v39 }
  0x73   : > { %1002 = vmatpush.msra.mxu2 %v2002_v62  ;;  %1059 = vmatpush.msra.mxu3 %v1598_v33 }
  0x74   : > { %871 = vmatpush.msra.mxu0 %v1682_v9  ;;  %921 = vmatpush.msra.mxu1 %v1598_v33 }
  0x75   : > { %1006 = vmatpush.msra.mxu2 %v2003_v23  ;;  %1061 = vmatpush.msra.mxu3 %v1613_v18 }
  0x76   : > { %874 = vmatpush.msra.mxu0 %v1704_v38  ;;  %716 = vmatmul.f32.gmra.mxu2 %v715_v54 }
  0x77   : > { %923 = vmatpush.msra.mxu1 %v1613_v18  ;;  %1010 = vmatpush.msra.mxu2 %v794_v17 }
  0x78   : > { %1063 = vmatpush.msra.mxu3 %v1639_v20  ;;  %877 = vmatpush.msra.mxu0 %v1717_v0 }
  0x79   : > { %829 = vmatmul.f32.gmra.mxu3 %v1818_v32  ;;  %925 = vmatpush.msra.mxu1 %v1639_v20 }
  0x7a   : > { %1014 = vmatpush.msra.mxu2 %v800_v21  ;;  %1065 = vmatpush.msra.mxu3 %v1652_v30 }
  0x7b   : > { %880 = vmatpush.msra.mxu0 %v1731_v35  ;;  %651 = vmatmul.f32.gmra.mxu1 %v1591_v31 }
  0x7c   : > { %883 = vmatmul.f32.vlgmr.msra.gmra.mxu0 %v1728_v11  ;;  %927 = vmatpush.msra.mxu1 %v1652_v30  ;;  %v1170_v11 = vld [vmem:[%s1933_s2] ss:$0 sm:$0xff] }
  0x7d   : > { %1018 = vmatpush.msra.mxu2 %v806_v1  ;;  %1067 = vmatpush.msra.mxu3 %v1673_v28 }
  0x7e   : > { %929 = vmatpush.msra.mxu1 %v1673_v28 }
  0x7f   : > { %1022 = vmatpush.msra.mxu2 %v812_v44  ;;  %1069 = vmatpush.msra.mxu3 %v1692_v42 }
  0x80   : > { %931 = vmatpush.msra.mxu1 %v1692_v42  ;;  %1024 = vmatmul.f32.vlgmr.msra.gmra.mxu2 %v1708_v52 }
  0x81   : > { %1071 = vmatpush.msra.mxu3 %v1706_v45 }
  0x82   : > { %933 = vmatpush.msra.mxu1 %v1706_v45  ;;  %1073 = vmatmul.f32.vlgmr.msra.gmra.mxu3 %v1708_v52 }
  0x83   : > { %937 = vmatmul.f32.vlgmr.msra.gmra.mxu1 %v689_v16 }
  0x84   : > { %888 = vmatmul.f32.gmra.mxu0 %v1772_v53 }
  0x88   : > { %1028 = vmatmul.f32.gmra.mxu2 %v1752_v14 }
  0x8a   : > { %1077 = vmatmul.f32.gmra.mxu3 %v1752_v14 }
  0x8b   : > { %943 = vmatmul.f32.gmra.mxu1 %v697_v8 }
  0x8c   : > { %893 = vmatmul.f32.gmra.mxu0 %v1801_v27 }
  0x90   : > { %1032 = vmatmul.f32.gmra.mxu2 %v1787_v58 }
  0x92   : > { %1081 = vmatmul.f32.gmra.mxu3 %v1787_v58 }
  0x93   : > { %949 = vmatmul.f32.gmra.mxu1 %v705_v29 }
  0x94   : > { %898 = vmatmul.f32.gmra.mxu0 %v1834_v50 }
  0x98   : > { %1036 = vmatmul.f32.gmra.mxu2 %v1818_v32 }
  0x9a   : > { %1085 = vmatmul.f32.gmra.mxu3 %v1818_v32 }
  0x9b   : > { %955 = vmatmul.f32.gmra.mxu1 %v713_v41 }
  0xaa   : > { %v259_v18 = vpop.f32.mrf.mxu0 }
  0xab   : > { %v260_v1 = vadd.f32 %v1170_v11, %v259_v18 }
  0xb2   : > { %v384_v47 = vpop.f32.mrf.mxu1 }
  0xb3   : > { %v267_v39 = vpop.f32.mrf.mxu0  ;;  %v385_v59 = vadd.f32 %v384_v47, %v260_v1 }
  0xb4   : > { %v450_v6 = vpop.f32.mrf.mxu2  ;;  %v504_v31 = vpop.f32.mrf.mxu3  ;;  %v268_v46 = vadd.f32 %v1170_v11, %v267_v39 }
  0xb5   : > { %v451_v4 = vadd.f32 %v450_v6, %v385_v59 }
  0xb7   : > { %v505_v56 = vadd.f32 %v504_v31, %v451_v4 }
  0xbc   : > { %v388_v61 = vpop.f32.mrf.mxu1 }
  0xbd   : > { %v275_v33 = vpop.f32.mrf.mxu0  ;;  %v455_v7 = vpop.f32.mrf.mxu2  ;;  %v389_v22 = vadd.f32 %v388_v61, %v268_v46 }
  0xbe   : > { %v276_v58 = vadd.f32 %v1170_v11, %v275_v33 }
  0xbf   : > { %v456_v10 = vadd.f32 %v455_v7, %v389_v22 }
  0xc0   : > { %v510_v20 = vpop.f32.mrf.mxu3 }
  0xc1   : > { %v511_v13 = vadd.f32 %v510_v20, %v456_v10 }
  0xc6   : > { %v392_v3 = vpop.f32.mrf.mxu1 }
  0xc7   : > { %v283_v45 = vpop.f32.mrf.mxu0  ;;  %v460_v30 = vpop.f32.mrf.mxu2  ;;  %v393_v27 = vadd.f32 %v392_v3, %v276_v58 }
  0xc8   : > { %v284_v2 = vadd.f32 %v1170_v11, %v283_v45 }
  0xc9   : > { %v461_v32 = vadd.f32 %v460_v30, %v393_v27 }
  0xca   : > { %v516_v38 = vpop.f32.mrf.mxu3 }
  0xcb   : > { %v517_v37 = vadd.f32 %v516_v38, %v461_v32 }
  0xd0   : > { %v396_v36 = vpop.f32.mrf.mxu1 }
  0xd1   : > { %v591_v28 = vpop.f32.mrf.mxu0  ;;  %v465_v9 = vpop.f32.mrf.mxu2  ;;  %v397_v43 = vadd.f32 %v396_v36, %v284_v2 }
  0xd2   : > { %v592_v8 = vadd.f32 %v591_v28, %v505_v56 }
  0xd3   : > { %v466_v62 = vadd.f32 %v465_v9, %v397_v43 }
  0xd4   : > { %v522_v42 = vpop.f32.mrf.mxu3 }
  0xd5   : > { %v523_v61 = vadd.f32 %v522_v42, %v466_v62 }
  0xda   : > { %v640_v52 = vpop.f32.mrf.mxu1 }
  0xdb   : > { %v595_v17 = vpop.f32.mrf.mxu0  ;;  %v641_v63 = vadd.f32 %v640_v52, %v592_v8 }
  0xdc   : > { %v693_v0 = vpop.f32.mrf.mxu2  ;;  %v596_v29 = vadd.f32 %v595_v17, %v511_v13 }
  0xdd   : > { %v694_v60 = vadd.f32 %v693_v0, %v641_v63 }
  0xde   : > { %v818_v21 = vpop.f32.mrf.mxu3 }
  0xdf   : > { %v819_v34 = vadd.f32 %v818_v21, %v694_v60 }
  0xe4   : > { %v644_v35 = vpop.f32.mrf.mxu1 }
  0xe5   : > { %v599_v16 = vpop.f32.mrf.mxu0  ;;  %v701_v44 = vpop.f32.mrf.mxu2  ;;  %v645_v25 = vadd.f32 %v644_v35, %v596_v29 }
  0xe6   : > { %v600_v55 = vadd.f32 %v599_v16, %v517_v37 }
  0xe7   : > { %v702_v41 = vadd.f32 %v701_v44, %v645_v25 }
  0xe8   : > { %v822_v14 = vpop.f32.mrf.mxu3 }
  0xe9   : > { %v823_v23 = vadd.f32 %v822_v14, %v702_v41 }
  0xee   : > { %v648_v53 = vpop.f32.mrf.mxu1 }
  0xef   : > { %v603_v24 = vpop.f32.mrf.mxu0  ;;  %v709_v51 = vpop.f32.mrf.mxu2  ;;  %v649_v18 = vadd.f32 %v648_v53, %v600_v55 }
  0xf0   : > { %v604_v3 = vadd.f32 %v603_v24, %v523_v61 }
  0xf1   : > { %v710_v33 = vadd.f32 %v709_v51, %v649_v18 }
  0xf2   : > { %v826_v19 = vpop.f32.mrf.mxu3 }
  0xf3   : > { %v827_v38 = vadd.f32 %v826_v19, %v710_v33 }
  0xf8   : > { %v652_v5 = vpop.f32.mrf.mxu1 }
  0xf9   : > { %v884_v15 = vpop.f32.mrf.mxu0  ;;  %v717_v48 = vpop.f32.mrf.mxu2  ;;  %v653_v36 = vadd.f32 %v652_v5, %v604_v3 }
  0xfa   : > { %v885_v57 = vadd.f32 %v884_v15, %v819_v34 }
  0xfb   : > { %v718_v0 = vadd.f32 %v717_v48, %v653_v36 }
  0xfc   : > { %v830_v40 = vpop.f32.mrf.mxu3 }
  0xfd   : > { %v831_v1 = vadd.f32 %v830_v40, %v718_v0 }
 0x100   : > { %v938_v50 = vpop.f32.mrf.mxu1 }
 0x101   : > { %v889_v12 = vpop.f32.mrf.mxu0  ;;  %v939_v26 = vadd.f32 %v938_v50, %v885_v57 }
 0x102   : > { %v890_v6 = vadd.f32 %v889_v12, %v823_v23 }
 0x103   : > { %v1025_v49 = vpop.f32.mrf.mxu2 }
 0x104   : > { %v1026_v54 = vadd.f32 %v1025_v49, %v939_v26 }
 0x105   : > { %v1074_v47 = vpop.f32.mrf.mxu3 }
 0x106   : > { %v1075_v39 = vadd.f32 %v1074_v47, %v1026_v54 }
 0x108   : > { %1089 = vst [vmem:[%s1922_s11] sm:$0xff] %v1075_v39  ;;  %v944_v31 = vpop.f32.mrf.mxu1 }
 0x109   : > { %v945_v7 = vadd.f32 %v944_v31, %v890_v6  ;;  %v894_v20 = vpop.f32.mrf.mxu0 }
 0x10a   : > { %v895_v52 = vadd.f32 %v894_v20, %v827_v38 }
 0x10b   : > { %v1029_v45 = vpop.f32.mrf.mxu2 }
 0x10c   : > { %v1030_v30 = vadd.f32 %v1029_v45, %v945_v7 }
 0x10d   : > { %v1078_v28 = vpop.f32.mrf.mxu3 }
 0x10e   : > { %v1079_v9 = vadd.f32 %v1078_v28, %v1030_v30 }
 0x110   : > { %1090 = vst [vmem:[%s1922_s11 + $0x8] sm:$0xff] %v1079_v9  ;;  %v950_v17 = vpop.f32.mrf.mxu1 }
 0x111   : > { %v951_v21 = vadd.f32 %v950_v17, %v895_v52  ;;  %v899_v35 = vpop.f32.mrf.mxu0 }
 0x112   : > { %v900_v14 = vadd.f32 %v899_v35, %v831_v1 }
 0x113   : > { %v1033_v11 = vpop.f32.mrf.mxu2 }
 0x114   : > { %v1034_v42 = vadd.f32 %v1033_v11, %v951_v21 }
 0x115   : > { %v1082_v16 = vpop.f32.mrf.mxu3 }
 0x116   : > { %v1083_v44 = vadd.f32 %v1082_v16, %v1034_v42 }
 0x118   : > { %1091 = vst [vmem:[%s1922_s11 + $0x10] sm:$0xff] %v1083_v44  ;;  %v956_v59 = vpop.f32.mrf.mxu1 }
 0x119   : > { %v957_v46 = vadd.f32 %v956_v59, %v900_v14 }
 0x11b   : > { %v1037_v4 = vpop.f32.mrf.mxu2 }
 0x11c   : > { %v1038_v53 = vadd.f32 %v1037_v4, %v957_v46 }
 0x11d   : > { %v1086_v24 = vpop.f32.mrf.mxu3 }
 0x11e   : > { %v1087_v51 = vadd.f32 %v1086_v24, %v1038_v53 }
 0x120   : > { %1092 = vst [vmem:[%s1922_s11 + $0x18] sm:$0xff] %v1087_v51 }
 0x121 PF: > { %s13_s12 = sadd.s32 1, %s1177_s12  }
 0x122   : > { %p10_p4 = scmp.ge.s32.totalorder %s13_s12, 4  }
 0x124   :  { %12 = sbr.rel (!%p10_p4) target bundleno = 1 (0x1), region = 62 }

</bundles_post_ra>
